<compile_context>
chip_gen: v6e
topology: v6e:2x2x1
jax: 0.10.0
libtpu: 0.0.40
codegen_flags: <defaults>
</compile_context>

<pallas_src>
import functools

import jax
import jax.numpy as jnp
from jax.experimental import pallas as pl
from jax.experimental.pallas import tpu as pltpu


NEG_SLOPE = 0.05  # matches nn.LeakyReLU(negative_slope=0.05) in the torch module


def _leaky_relu(x):
    return jnp.where(x > 0, x, NEG_SLOPE * x)


def _round_up(n, m):
    return ((n + m - 1) // m) * m


def _choose_batch_tile(B, target_tiles=1, max_tile=4096):
    """Pick a lane-dense batch tile: biggest tile for 1-TC chips, >=target_tiles tiles
    for megacore (v7x), capped so per-tile VMEM stays small and padding stays tiny."""
    n_tiles = max(int(target_tiles), 1, -(-B // max_tile))
    bt = _round_up(-(-B // n_tiles), 128)
    return max(128, min(bt, max_tile))


# ---------------------------------------------------------------------------
# Kernel: 4 MXU matmuls on transposed activations, all heads fused into one slab.
# ---------------------------------------------------------------------------
def mynet_kernel(
    xT_ref,     # (k, bt)       transposed input tile (compute dtype)
    we1_ref,    # (L1, k)       encoder1 weight (padded rows)
    we2_ref,    # (L2, L1)      encoder2 weight
    wh1_ref,    # (H1, L2)      fused head layer-1 weight [decoder1; classifier1; predictor1]
    wh2_ref,    # (H2, H1)      fused head layer-2 weight (block-diagonal)
    b_ref,      # (L1+L2+H1+H2, 1) f32, all biases packed
    out_ref,    # (H2, bt)      fused f32 output slab
    *, l1, l2, h1,
):
    x = xT_ref[...]
    cdt = x.dtype

    # Static slices of the packed bias blob (all segment offsets/lengths are x8 aligned).
    b1 = b_ref[0:l1]
    b2 = b_ref[l1:l1 + l2]
    b3 = b_ref[l1 + l2:l1 + l2 + h1]
    b4 = b_ref[l1 + l2 + h1:]

    # ---- encoder ----
    h = jnp.dot(we1_ref[...], x, preferred_element_type=jnp.float32) + b1
    h = _leaky_relu(h).astype(cdt)                                   # (L1, bt)
    z = jnp.dot(we2_ref[...], h, preferred_element_type=jnp.float32) + b2
    z = _leaky_relu(z).astype(cdt)                                   # (L2, bt)

    # ---- fused head layer 1 (decoder1 | classifier1 | predictor1) ----
    a = jnp.dot(wh1_ref[...], z, preferred_element_type=jnp.float32) + b3
    a = _leaky_relu(a).astype(cdt)                                   # (H1, bt)

    # ---- fused head layer 2 (block-diagonal decoder2/classifier2/predictor2) ----
    o = jnp.dot(wh2_ref[...], a, preferred_element_type=jnp.float32) + b4
    out_ref[...] = o.astype(out_ref.dtype)                           # (H2, bt)


# ---------------------------------------------------------------------------
# One-time parameter packing (call ONCE, outside the per-step forward).
# ---------------------------------------------------------------------------
def prepare_params(params, *, compute_dtype=jnp.bfloat16):
    """Fuse the three heads, pad every hidden dim to a sublane (x8) multiple, pack all
    biases into one operand, and cast weights to the MXU compute dtype.  Returns a dict
    of device arrays that is passed unchanged to mynet_forward on every call."""
    we1, be1 = params["we1"], params["be1"]
    we2, be2 = params["we2"], params["be2"]
    wd1, bd1 = params["wd1"], params["bd1"]
    wd2, bd2 = params["wd2"], params["bd2"]
    wc1, bc1 = params["wc1"], params["bc1"]
    wc2, bc2 = params["wc2"], params["bc2"]
    wp1, bp1 = params["wp1"], params["bp1"]
    wp2, bp2 = params["wp2"], params["bp2"]

    k = we1.shape[1]
    l1, l2 = we1.shape[0], we2.shape[0]
    l3, l4 = wc1.shape[0], wp1.shape[0]
    po = wc2.shape[0]
    h1 = l1 + l3 + l4                     # fused head hidden width
    h2 = k + po + 1                       # fused output slab width

    l1p, l2p = _round_up(l1, 8), _round_up(l2, 8)
    h1p, h2p = _round_up(h1, 8), _round_up(h2, 8)

    def pad2(w, r, c):
        return jnp.pad(w, ((0, r - w.shape[0]), (0, c - w.shape[1])))

    def pad1(b, r):
        return jnp.pad(b, (0, r - b.shape[0]))

    we1_p = pad2(we1, l1p, k)                                    # (L1, k)
    we2_p = pad2(we2, l2p, l1p)                                  # (L2, L1)

    wh1 = jnp.concatenate([wd1, wc1, wp1], axis=0)               # (h1, l2)
    wh1_p = pad2(wh1, h1p, l2p)                                  # (H1, L2)

    wh2 = jnp.zeros((h2p, h1p), jnp.float32)                     # (H2, H1) block-diag
    wh2 = wh2.at[:k, :l1].set(wd2)
    wh2 = wh2.at[k:k + po, l1:l1 + l3].set(wc2)
    wh2 = wh2.at[k + po:k + po + 1, l1 + l3:l1 + l3 + l4].set(wp2)

    bias = jnp.concatenate([
        pad1(be1, l1p),
        pad1(be2, l2p),
        pad1(jnp.concatenate([bd1, bc1, bp1]), h1p),
        pad1(jnp.concatenate([bd2, bc2, bp2]), h2p),
    ]).reshape(-1, 1).astype(jnp.float32)

    cdt = compute_dtype
    return {
        "we1": we1_p.astype(cdt),
        "we2": we2_p.astype(cdt),
        "wh1": wh1_p.astype(cdt),
        "wh2": wh2.astype(cdt),
        "bias": bias,
    }


# ---------------------------------------------------------------------------
# Forward pass (jit this; all shapes below are static at trace time).
# ---------------------------------------------------------------------------
def mynet_forward(x, packed, *, predict_out, target_tiles=1, max_batch_tile=4096):
    """x: (B, k) float32.  packed: output of prepare_params().  Returns
    (out2, out3, out4) float32, matching the torch module semantics."""
    B = x.shape[0]
    we1, we2, wh1, wh2, bias = (packed["we1"], packed["we2"], packed["wh1"],
                                packed["wh2"], packed["bias"])
    cdt = we1.dtype
    k = we1.shape[1]
    l1, l2 = we1.shape[0], we2.shape[0]
    h1, h2 = wh1.shape[0], wh2.shape[0]

    # Lane-dense transposed activations, padded batch (pad only if needed).
    bt = _choose_batch_tile(B, target_tiles, max_batch_tile)
    B_pad = _round_up(B, bt)
    xT = x.T.astype(cdt)                                         # (k, B): batch on lanes
    if B_pad != B:
        xT = jnp.pad(xT, ((0, 0), (0, B_pad - B)))

    grid = (B_pad // bt,)
    kernel = functools.partial(mynet_kernel, l1=l1, l2=l2, h1=h1)

    const2d = lambda i: (0, 0)
    in_specs = [
        pl.BlockSpec((k, bt), lambda i: (0, i)),
        pl.BlockSpec(we1.shape, const2d),
        pl.BlockSpec(we2.shape, const2d),
        pl.BlockSpec(wh1.shape, const2d),
        pl.BlockSpec(wh2.shape, const2d),
        pl.BlockSpec(bias.shape, const2d),
    ]
    out_spec = pl.BlockSpec((h2, bt), lambda i: (0, i))

    slab = pl.pallas_call(
        kernel,
        out_shape=jax.ShapeDtypeStruct((h2, B_pad), jnp.float32),
        grid_spec=pltpu.PrefetchScalarGridSpec(
            num_scalar_prefetch=0,
            grid=grid,
            in_specs=in_specs,
            out_specs=out_spec,
        ),
        compiler_params=pltpu.CompilerParams(
            dimension_semantics=("parallel",),   # batch tiles shard across v7x TCs
        ),
    )(xT, we1, we2, wh1, wh2, bias)

    # Single wrapper transpose, then cheap slices of the fused slab.
    slabT = slab.T[:B]                                           # (B, H2)
    out2 = slabT[:, :k]                                          # (B, k)
    out3 = slabT[:, k:k + predict_out]                           # (B, predict_out)
    out4 = slabT[:, k + predict_out:k + predict_out + 1]         # (B, 1)
    return out2, out3, out4


# ---------------------------------------------------------------------------
# PyTorch-layout init + pure-JAX reference (for correctness checking only).
# ---------------------------------------------------------------------------
def init_params(key, k, lspace2, predict_out):
    """nn.Linear-style init: W (out, in), b (out,), U[-1/sqrt(fan_in), 1/sqrt(fan_in)]."""
    lspace1 = int((k + lspace2) / 2)
    lspace3 = int((lspace2 + 4) / 2)
    lspace4 = int((lspace2 + 1) / 2)

    dims = {
        "e1": (k, lspace1),
        "e2": (lspace1, lspace2),
        "d1": (lspace2, lspace1),
        "d2": (lspace1, k),
        "c1": (lspace2, lspace3),
        "c2": (lspace3, predict_out),
        "p1": (lspace2, lspace4),
        "p2": (lspace4, 1),
    }

    params = {}
    keys = jax.random.split(key, 2 * len(dims))
    for i, (name, (fan_in, fan_out)) in enumerate(dims.items()):
        bound = 1.0 / float(fan_in) ** 0.5
        w = jax.random.uniform(keys[2 * i], (fan_out, fan_in), jnp.float32, -bound, bound)
        b = jax.random.uniform(keys[2 * i + 1], (fan_out,), jnp.float32, -bound, bound)
        params[f"w{name}"] = w
        params[f"b{name}"] = b
    return params


def reference_forward(x, params):
    lrelu = lambda v: jnp.where(v > 0, v, NEG_SLOPE * v)
    lin = lambda v, w, b: v @ w.T + b
    h = lrelu(lin(x, params["we1"], params["be1"]))
    z = lrelu(lin(h, params["we2"], params["be2"]))
    out2 = lin(lrelu(lin(z, params["wd1"], params["bd1"])), params["wd2"], params["bd2"])
    out3 = lin(lrelu(lin(z, params["wc1"], params["bc1"])), params["wc2"], params["bc2"])
    out4 = lin(lrelu(lin(z, params["wp1"], params["bp1"])), params["wp2"], params["bp2"])
    return out2, out3, out4


if __name__ == "__main__":
    # Shapes implied by the module: x is (batch, k) feature vectors.
    batch = 500          # NOT a multiple of the tile -> exercises the padding path
    k = 32
    lspace2 = 16
    predict_out = 4

    key = jax.random.PRNGKey(0)
    kx, kp = jax.random.split(key)
    x = jax.random.normal(kx, (batch, k), dtype=jnp.float32)
    params = init_params(kp, k, lspace2, predict_out)
    r2, r3, r4 = reference_forward(x, params)

    # --- f32 path: single biggest tile (v5e/v6e style), tight parity check ---
    packed_f32 = prepare_params(params, compute_dtype=jnp.float32)   # one-time packing
    fwd_f32 = jax.jit(functools.partial(
        mynet_forward, predict_out=predict_out, target_tiles=1))
    out2, out3, out4 = fwd_f32(x, packed_f32)
    jax.block_until_ready((out2, out3, out4))

    assert out2.shape == (batch, k)
    assert out3.shape == (batch, predict_out)
    assert out4.shape == (batch, 1)
    assert jnp.allclose(out2, r2, atol=1e-4, rtol=1e-4)
    assert jnp.allclose(out3, r3, atol=1e-4, rtol=1e-4)
    assert jnp.allclose(out4, r4, atol=1e-4, rtol=1e-4)

    # --- bf16 default path: 2 batch tiles (v7x megacore style), loose tolerance ---
    packed_bf16 = prepare_params(params)                              # bf16 by default
    fwd_bf16 = jax.jit(functools.partial(
        mynet_forward, predict_out=predict_out, target_tiles=2))
    b2, b3, b4 = fwd_bf16(x, packed_bf16)
    jax.block_until_ready((b2, b3, b4))

    assert b2.dtype == jnp.float32 and b2.shape == (batch, k)
    assert jnp.allclose(b2, r2, atol=2e-1, rtol=2e-1)
    assert jnp.allclose(b3, r3, atol=2e-1, rtol=2e-1)
    assert jnp.allclose(b4, r4, atol=2e-1, rtol=2e-1)

    print("KERNEL_OK")
</pallas_src>

<mosaic_0001>
module attributes {stable_mosaic.version = 11 : i64} {
  func.func @mynet_kernel(%arg0: i32, %arg1: memref<32x512xf32, #tpu.memory_space<vmem>>, %arg2: memref<24x32xf32, #tpu.memory_space<vmem>>, %arg3: memref<16x24xf32, #tpu.memory_space<vmem>>, %arg4: memref<48x16xf32, #tpu.memory_space<vmem>>, %arg5: memref<40x48xf32, #tpu.memory_space<vmem>>, %arg6: memref<128x1xf32, #tpu.memory_space<vmem>>, %arg7: memref<40x512xf32, #tpu.memory_space<vmem>>) attributes {dimension_semantics = [#tpu.dimension_semantics<parallel>], iteration_bounds = array<i64: 1>, scalar_prefetch = 0 : i64, scratch_operands = 0 : i64, tpu.core_type = #tpu.core_type<tc>, window_params = [{transform_indices = @transform_0, window_bounds = array<i64: 32, 512>}, {pipeline_mode = #tpu.pipeline_mode<synchronous>, transform_indices = @transform_1, window_bounds = array<i64: 24, 32>}, {pipeline_mode = #tpu.pipeline_mode<synchronous>, transform_indices = @transform_2, window_bounds = array<i64: 16, 24>}, {pipeline_mode = #tpu.pipeline_mode<synchronous>, transform_indices = @transform_3, window_bounds = array<i64: 48, 16>}, {pipeline_mode = #tpu.pipeline_mode<synchronous>, transform_indices = @transform_4, window_bounds = array<i64: 40, 48>}, {pipeline_mode = #tpu.pipeline_mode<synchronous>, transform_indices = @transform_5, window_bounds = array<i64: 128, 1>}, {transform_indices = @transform_6, window_bounds = array<i64: 40, 512>}]} {
    %c0 = arith.constant 0 : index
    %c0_0 = arith.constant 0 : index
    %0 = vector.load %arg1[%c0, %c0_0] : memref<32x512xf32, #tpu.memory_space<vmem>>, vector<32x512xf32>
    %c0_1 = arith.constant 0 : index
    %c0_2 = arith.constant 0 : index
    %1 = vector.load %arg6[%c0_1, %c0_2] : memref<128x1xf32, #tpu.memory_space<vmem>>, vector<24x1xf32>
    %c24 = arith.constant 24 : index
    %c0_3 = arith.constant 0 : index
    %2 = vector.load %arg6[%c24, %c0_3] : memref<128x1xf32, #tpu.memory_space<vmem>>, vector<16x1xf32>
    %c40 = arith.constant 40 : index
    %c0_4 = arith.constant 0 : index
    %3 = vector.load %arg6[%c40, %c0_4] : memref<128x1xf32, #tpu.memory_space<vmem>>, vector<48x1xf32>
    %c88 = arith.constant 88 : index
    %c0_5 = arith.constant 0 : index
    %4 = vector.load %arg6[%c88, %c0_5] : memref<128x1xf32, #tpu.memory_space<vmem>>, vector<40x1xf32>
    %c0_6 = arith.constant 0 : index
    %c0_7 = arith.constant 0 : index
    %5 = vector.load %arg2[%c0_6, %c0_7] : memref<24x32xf32, #tpu.memory_space<vmem>>, vector<24x32xf32>
    %cst = arith.constant dense<0.000000e+00> : vector<24x512xf32>
    %6 = tpu.matmul %5, %0, %cst {dimension_numbers = #tpu.dot_dimension_numbers<[1], [0], [0], [1], [0, 0, 1, 1], [], []>} : vector<24x32xf32>, vector<32x512xf32>, vector<24x512xf32> -> vector<24x512xf32>
    %7 = vector.broadcast %1 : vector<24x1xf32> to vector<24x512xf32>
    %8 = arith.addf %6, %7 : vector<24x512xf32>
    %cst_8 = arith.constant 0.000000e+00 : f32
    %9 = vector.broadcast %cst_8 : f32 to vector<24x512xf32>
    %10 = arith.cmpf ogt, %8, %9 : vector<24x512xf32>
    %cst_9 = arith.constant 5.000000e-02 : f32
    %11 = vector.broadcast %cst_9 : f32 to vector<24x512xf32>
    %12 = arith.mulf %11, %8 : vector<24x512xf32>
    %13 = arith.select %10, %8, %12 : vector<24x512xi1>, vector<24x512xf32>
    %c0_10 = arith.constant 0 : index
    %c0_11 = arith.constant 0 : index
    %14 = vector.load %arg3[%c0_10, %c0_11] : memref<16x24xf32, #tpu.memory_space<vmem>>, vector<16x24xf32>
    %cst_12 = arith.constant dense<0.000000e+00> : vector<16x512xf32>
    %15 = tpu.matmul %14, %13, %cst_12 {dimension_numbers = #tpu.dot_dimension_numbers<[1], [0], [0], [1], [0, 0, 1, 1], [], []>} : vector<16x24xf32>, vector<24x512xf32>, vector<16x512xf32> -> vector<16x512xf32>
    %16 = vector.broadcast %2 : vector<16x1xf32> to vector<16x512xf32>
    %17 = arith.addf %15, %16 : vector<16x512xf32>
    %cst_13 = arith.constant 0.000000e+00 : f32
    %18 = vector.broadcast %cst_13 : f32 to vector<16x512xf32>
    %19 = arith.cmpf ogt, %17, %18 : vector<16x512xf32>
    %cst_14 = arith.constant 5.000000e-02 : f32
    %20 = vector.broadcast %cst_14 : f32 to vector<16x512xf32>
    %21 = arith.mulf %20, %17 : vector<16x512xf32>
    %22 = arith.select %19, %17, %21 : vector<16x512xi1>, vector<16x512xf32>
    %c0_15 = arith.constant 0 : index
    %c0_16 = arith.constant 0 : index
    %23 = vector.load %arg4[%c0_15, %c0_16] : memref<48x16xf32, #tpu.memory_space<vmem>>, vector<48x16xf32>
    %cst_17 = arith.constant dense<0.000000e+00> : vector<48x512xf32>
    %24 = tpu.matmul %23, %22, %cst_17 {dimension_numbers = #tpu.dot_dimension_numbers<[1], [0], [0], [1], [0, 0, 1, 1], [], []>} : vector<48x16xf32>, vector<16x512xf32>, vector<48x512xf32> -> vector<48x512xf32>
    %25 = vector.broadcast %3 : vector<48x1xf32> to vector<48x512xf32>
    %26 = arith.addf %24, %25 : vector<48x512xf32>
    %cst_18 = arith.constant 0.000000e+00 : f32
    %27 = vector.broadcast %cst_18 : f32 to vector<48x512xf32>
    %28 = arith.cmpf ogt, %26, %27 : vector<48x512xf32>
    %cst_19 = arith.constant 5.000000e-02 : f32
    %29 = vector.broadcast %cst_19 : f32 to vector<48x512xf32>
    %30 = arith.mulf %29, %26 : vector<48x512xf32>
    %31 = arith.select %28, %26, %30 : vector<48x512xi1>, vector<48x512xf32>
    %c0_20 = arith.constant 0 : index
    %c0_21 = arith.constant 0 : index
    %32 = vector.load %arg5[%c0_20, %c0_21] : memref<40x48xf32, #tpu.memory_space<vmem>>, vector<40x48xf32>
    %cst_22 = arith.constant dense<0.000000e+00> : vector<40x512xf32>
    %33 = tpu.matmul %32, %31, %cst_22 {dimension_numbers = #tpu.dot_dimension_numbers<[1], [0], [0], [1], [0, 0, 1, 1], [], []>} : vector<40x48xf32>, vector<48x512xf32>, vector<40x512xf32> -> vector<40x512xf32>
    %34 = vector.broadcast %4 : vector<40x1xf32> to vector<40x512xf32>
    %35 = arith.addf %33, %34 : vector<40x512xf32>
    %c0_23 = arith.constant 0 : index
    %c0_24 = arith.constant 0 : index
    %36 = vector.load %arg7[%c0_23, %c0_24] : memref<40x512xf32, #tpu.memory_space<vmem>>, vector<40x512xf32>
    tpu.vector_store %arg7[%c0_23, %c0_24], %35 {strides = array<i32>} : memref<40x512xf32, #tpu.memory_space<vmem>>, vector<40x512xf32>,
    return
  }
  func.func @transform_0(%arg0: i32) -> (i32, i32) {
    %c0_i32 = arith.constant 0 : i32
    %c0_i32_0 = arith.constant 0 : i32
    return %c0_i32, %arg0 : i32, i32
  }
  func.func @transform_1(%arg0: i32) -> (i32, i32) {
    %c0_i32 = arith.constant 0 : i32
    %c0_i32_0 = arith.constant 0 : i32
    %c0_i32_1 = arith.constant 0 : i32
    return %c0_i32, %c0_i32_0 : i32, i32
  }
  func.func @transform_2(%arg0: i32) -> (i32, i32) {
    %c0_i32 = arith.constant 0 : i32
    %c0_i32_0 = arith.constant 0 : i32
    %c0_i32_1 = arith.constant 0 : i32
    return %c0_i32, %c0_i32_0 : i32, i32
  }
  func.func @transform_3(%arg0: i32) -> (i32, i32) {
    %c0_i32 = arith.constant 0 : i32
    %c0_i32_0 = arith.constant 0 : i32
    %c0_i32_1 = arith.constant 0 : i32
    return %c0_i32, %c0_i32_0 : i32, i32
  }
  func.func @transform_4(%arg0: i32) -> (i32, i32) {
    %c0_i32 = arith.constant 0 : i32
    %c0_i32_0 = arith.constant 0 : i32
    %c0_i32_1 = arith.constant 0 : i32
    return %c0_i32, %c0_i32_0 : i32, i32
  }
  func.func @transform_5(%arg0: i32) -> (i32, i32) {
    %c0_i32 = arith.constant 0 : i32
    %c0_i32_0 = arith.constant 0 : i32
    %c0_i32_1 = arith.constant 0 : i32
    return %c0_i32, %c0_i32_0 : i32, i32
  }
  func.func @transform_6(%arg0: i32) -> (i32, i32) {
    %c0_i32 = arith.constant 0 : i32
    %c0_i32_0 = arith.constant 0 : i32
    return %c0_i32, %arg0 : i32, i32
  }
}

</mosaic_0001>

<bundles_post_ra>
// kernel: mynet_forward.1
= control target key start
LH: loop header
LB: loop body
LE: loop exit
PB: predicated region body
PF: predicated region fallthrough
CT: control target
= control target key end

     0   :  { %v1107_v3 = vmov 0.0   ;;  %vm73_vm0 = vcmask 261120   ;;  %v1108_v21 = vmov 0   ;;  %vm297_vm13 = vcmask 195584   ;;  %s1594_s0 = inlined_call_operand.vmem [shape: f32[32,512], index: 0, kind: input, shape index: {}]   ;;  %s1595_s1 = inlined_call_operand.vmem [shape: f32[24,32], index: 1, kind: input, shape index: {}]   ;;  %s1596_s5 = inlined_call_operand.vmem [shape: f32[128,1], index: 5, kind: input, shape index: {}]   ;;  %s1597_s2 = inlined_call_operand.vmem [shape: f32[16,24], index: 2, kind: input, shape index: {}]   ;;  %s1598_s3 = inlined_call_operand.vmem [shape: f32[48,16], index: 3, kind: input, shape index: {}]   ;;  %s1599_s4 = inlined_call_operand.vmem [shape: f32[40,48], index: 4, kind: input, shape index: {}]   ;;  %s1600_s6 = inlined_call_operand.vmem [shape: f32[40,512], index: 6, kind: output, shape index: {}]  }
   0x1   :  { %v36_v0 = vld [vmem:[%s1594_s0 + $0x68] sm:$0xff]  ;;  %v38_v1 = vld [vmem:[%s1594_s0 + $0x78] sm:$0xff]  ;;  %v35_v2 = vld [vmem:[%s1594_s0 + $0x60] sm:$0xff]  ;;  %147 = vmatprep.mubr.f32.mxu0 %v1107_v3  ;;  %230 = vmatprep.mubr.f32.mxu1 %v1107_v3 }
   0x2   :  { %107 = vmatprep.subr.mxu0 %v36_v0  ;;  %190 = vmatprep.subr.mxu1 %v38_v1  ;;  %v37_v4 = vld [vmem:[%s1594_s0 + $0x70] sm:$0xff]  ;;  %v32_v5 = vld [vmem:[%s1594_s0 + $0x48] sm:$0xff]  ;;  %v34_v6 = vld [vmem:[%s1594_s0 + $0x58] sm:$0xff] }
   0x3   :  { %108 = vmatpush1.msra.mxu0 %v35_v2  ;;  %191 = vmatpush1.msra.mxu1 %v37_v4  ;;  %v31_v7 = vld [vmem:[%s1594_s0 + $0x40] sm:$0xff]  ;;  %v33_v8 = vld [vmem:[%s1594_s0 + $0x50] sm:$0xff]  ;;  %v28_v9 = vld [vmem:[%s1594_s0 + $0x28] sm:$0xff] }
   0x4   :  { %109 = vmatprep.subr.mxu0 %v32_v5  ;;  %192 = vmatprep.subr.mxu1 %v34_v6  ;;  %v30_v10 = vld [vmem:[%s1594_s0 + $0x38] sm:$0xff]  ;;  %v27_v11 = vld [vmem:[%s1594_s0 + $0x20] sm:$0xff]  ;;  %v29_v12 = vld [vmem:[%s1594_s0 + $0x30] sm:$0xff] }
   0x5   :  { %110 = vmatpush1.msra.mxu0 %v31_v7  ;;  %193 = vmatpush1.msra.mxu1 %v33_v8  ;;  %v24_v13 = vld [vmem:[%s1594_s0 + $0x8] sm:$0xff]  ;;  %v26_v14 = vld [vmem:[%s1594_s0 + $0x18] sm:$0xff]  ;;  %v23_v15 = vld [vmem:[%s1594_s0] sm:$0xff] }
   0x6   :  { %111 = vmatprep.subr.mxu0 %v28_v9  ;;  %194 = vmatprep.subr.mxu1 %v30_v10  ;;  %v25_v16 = vld [vmem:[%s1594_s0 + $0x10] sm:$0xff]  ;;  %v55_v17 = vld [vmem:[%s1595_s1] sm:$0xff]  ;;  %v56_v20 = vld [vmem:[%s1595_s1 + $0x8] sm:$0xff] }
   0x7   :  { %112 = vmatpush1.msra.mxu0 %v27_v11  ;;  %195 = vmatpush1.msra.mxu1 %v29_v12  ;;  %v41_v18 = vld [vmem:[%s1596_s5 + $0x10] sm:$0xff]  ;;  %v39_v19 = vld [vmem:[%s1596_s5] sm:$0xff]  ;;  %v40_v22 = vld [vmem:[%s1596_s5 + $0x8] sm:$0xff] }
   0x8   :  { %113 = vmatprep.subr.mxu0 %v24_v13  ;;  %196 = vmatprep.subr.mxu1 %v26_v14  ;;  %v43_v23 = vld [vmem:[%s1596_s5 + $0x20] sm:$0xff]  ;;  %v57_v24 = vld [vmem:[%s1595_s1 + $0x10] sm:$0xff]  ;;  %v42_v25 = vld [vmem:[%s1596_s5 + $0x18] sm:$0xff] }
   0x9   :  { %114 = vmatpush1.msra.mxu0 %v23_v15  ;;  %197 = vmatpush1.msra.mxu1 %v25_v16  ;;  %v49_v26 = vld [vmem:[%s1596_s5 + $0x50] sm:$0xff]  ;;  %v48_v27 = vld [vmem:[%s1596_s5 + $0x48] sm:$0xff]  ;;  %v47_v28 = vld [vmem:[%s1596_s5 + $0x40] sm:$0xff] }
   0xa   :  { %1071 = vmatmul.mubr.msk.f32.vlgmr.msra.gmra.mxu0 %vm73_vm0, %v55_v17  ;;  %1074 = vmatmul.mubr.msk.f32.vlgmr.msra.gmra.mxu1 %vm73_vm0, %v55_v17  ;;  %v46_v29 = vld [vmem:[%s1596_s5 + $0x38] sm:$0xff]  ;;  %v45_v30 = vld [vmem:[%s1596_s5 + $0x30] sm:$0xff]  ;;  %v44_v31 = vld [vmem:[%s1596_s5 + $0x28] sm:$0xff] }
   0xb   :  { %153 = vmatprep.mubr.f32.mxu0 %v1107_v3  ;;  %236 = vmatprep.mubr.f32.mxu1 %v1107_v3  ;;  %v50_v32 = vld [vmem:[%s1596_s5 + $0x58] sm:$0xff]  ;;  %v51_v33 = vld [vmem:[%s1596_s5 + $0x60] sm:$0xff]  ;;  %v52_v34 = vld [vmem:[%s1596_s5 + $0x68] sm:$0xff] }
   0xc   :  { %1105 = vset.pattern.permute.xlu0 %v1108_v21  ;;  %1106 = vset.pattern.permute.xlu1 %v1108_v21  ;;  %v53_v35 = vld [vmem:[%s1596_s5 + $0x70] sm:$0xff]  ;;  %v54_v36 = vld [vmem:[%s1596_s5 + $0x78] sm:$0xff] }
   0xd   :  { %70 = vperm.xlu0 %1105, %v41_v18   ;;  %60 = vperm.xlu1 %1106, %v39_v19  }
   0xe   :  { %1072 = vmatmul.mubr.msk.f32.gmra.mxu0 %vm73_vm0, %v56_v20  ;;  %1075 = vmatmul.mubr.msk.f32.gmra.mxu1 %vm73_vm0, %v56_v20 }
   0xf   :  { %159 = vmatprep.mubr.f32.mxu0 %v1107_v3  ;;  %242 = vmatprep.mubr.f32.mxu1 %v1107_v3 }
  0x11   :  { %65 = vperm.xlu0 %1105, %v40_v22   ;;  %294 = vperm.xlu1 %1106, %v43_v23   ;;  %v285_v23 = vld [vmem:[%s1597_s2] sm:$0xff] }
  0x12   :  { %1073 = vmatmul.mubr.msk.f32.gmra.mxu0 %vm73_vm0, %v57_v24  ;;  %1076 = vmatmul.mubr.msk.f32.gmra.mxu1 %vm73_vm0, %v57_v24 }
  0x13   :  { %368 = vmatprep.mubr.f32.mxu0 %v1107_v3  ;;  %445 = vmatprep.mubr.f32.mxu1 %v1107_v3 }
  0x15   :  { %289 = vperm.xlu0 %1105, %v42_v25   ;;  %515 = vperm.xlu1 %1106, %v49_v26   ;;  %v286_v26 = vld [vmem:[%s1597_s2 + $0x8] sm:$0xff] }
  0x19   :  { %510 = vperm.xlu0 %1105, %v48_v27   ;;  %505 = vperm.xlu1 %1106, %v47_v28  }
  0x1d   :  { %500 = vperm.xlu0 %1105, %v46_v29   ;;  %495 = vperm.xlu1 %1106, %v45_v30  }
  0x21   :  { %490 = vperm.xlu0 %1105, %v44_v31   ;;  %818 = vperm.xlu1 %1106, %v50_v32  }
  0x25   :  { %823 = vperm.xlu0 %1105, %v51_v33   ;;  %828 = vperm.xlu1 %1106, %v52_v34  }
  0x29   :  { %833 = vperm.xlu0 %1105, %v53_v35   ;;  %838 = vperm.xlu1 %1106, %v54_v36  }
  0x88   :  { %v71_v39 = vpop.permute.xlu0 %70  ;;  %v61_v44 = vpop.permute.xlu1 %60 }
  0x8c   :  { %v66_v49 = vpop.permute.xlu0 %65  ;;  %v295_v32 = vpop.permute.xlu1 %294 }
  0x90   :  { %v290_v31 = vpop.permute.xlu0 %289 }
  0xca   :  { %v149_v37 = vpop.f32.mrf.mxu0  ;;  %v232_v38 = vpop.f32.mrf.mxu1 }
  0xcb   :  { %v1263_v45 = vadd.f32 %v149_v37, %v61_v44  ;;  %v1265_v46 = vadd.f32 %v232_v38, %v61_v44 }
  0xcc   :  { %v151_v40 = vpop.f32.mrf.mxu0  ;;  %v234_v41 = vpop.f32.mrf.mxu1 }
  0xcd   :  { %v152_v50 = vadd.f32 %v151_v40, %v61_v44  ;;  %v235_v51 = vadd.f32 %v234_v41, %v61_v44  ;;  %v261_v58 = vmul.f32 0.05, %v1263_v45  ;;  %v263_v59 = vmul.f32 0.05, %v1265_v46 }
  0xce   :  { %v155_v42 = vpop.f32.mrf.mxu0  ;;  %v238_v43 = vpop.f32.mrf.mxu1  ;;  %vm249_vm11 = vcmp.gt.f32.partialorder %v1263_v45, 0.0  ;;  %vm251_vm12 = vcmp.gt.f32.partialorder %v1265_v46, 0.0 }
  0xcf   :  { %v262_v62 = vmul.f32 0.05, %v152_v50  ;;  %v264_v63 = vmul.f32 0.05, %v235_v51  ;;  %v156_v0 = vadd.f32 %v155_v42, %v66_v49  ;;  %v239_v1 = vadd.f32 %v238_v43, %v66_v49 }
  0xd0   :  { %v157_v47 = vpop.f32.mrf.mxu0  ;;  %v240_v48 = vpop.f32.mrf.mxu1  ;;  %vm250_vm9 = vcmp.gt.f32.partialorder %v152_v50, 0.0  ;;  %vm252_vm10 = vcmp.gt.f32.partialorder %v235_v51, 0.0  ;;  %v273_v24 = vsel %vm249_vm11, %v1263_v45, %v261_v58  ;;  %v275_v25 = vsel %vm251_vm12, %v1265_v46, %v263_v59  ;;  %v482_v59 = vld [vmem:[%s1598_s3] sm:$0xff] }
  0xd1   :  { %v158_v52 = vadd.f32 %v157_v47, %v66_v49  ;;  %v241_v53 = vadd.f32 %v240_v48, %v66_v49  ;;  %v265_v11 = vmul.f32 0.05, %v156_v0  ;;  %v267_v12 = vmul.f32 0.05, %v239_v1 }
  0xd2   :  { %v161_v54 = vpop.f32.mrf.mxu0  ;;  %v244_v55 = vpop.f32.mrf.mxu1  ;;  %vm253_vm7 = vcmp.gt.f32.partialorder %v156_v0, 0.0  ;;  %vm255_vm8 = vcmp.gt.f32.partialorder %v239_v1, 0.0  ;;  %v274_v21 = vsel %vm250_vm9, %v152_v50, %v262_v62  ;;  %v276_v22 = vsel %vm252_vm10, %v235_v51, %v264_v63  ;;  %v483_v62 = vld [vmem:[%s1598_s3 + $0x8] sm:$0xff]  ;;  %v484_v63 = vld [vmem:[%s1598_s3 + $0x10] sm:$0xff] }
  0xd3   :  { %v162_v56 = vadd.f32 %v161_v54, %v71_v39  ;;  %v245_v57 = vadd.f32 %v244_v55, %v71_v39  ;;  %v266_v2 = vmul.f32 0.05, %v158_v52  ;;  %v268_v4 = vmul.f32 0.05, %v241_v53 }
  0xd4   :  { %v163_v60 = vpop.f32.mrf.mxu0  ;;  %v246_v61 = vpop.f32.mrf.mxu1  ;;  %vm254_vm5 = vcmp.gt.f32.partialorder %v158_v52, 0.0  ;;  %vm256_vm6 = vcmp.gt.f32.partialorder %v241_v53, 0.0  ;;  %v277_v19 = vsel %vm253_vm7, %v156_v0, %v265_v11  ;;  %v279_v20 = vsel %vm255_vm8, %v239_v1, %v267_v12  ;;  %v485_v0 = vld [vmem:[%s1598_s3 + $0x18] sm:$0xff]  ;;  %v486_v1 = vld [vmem:[%s1598_s3 + $0x20] sm:$0xff] }
  0xd5   :  { %v164_v5 = vadd.f32 %v163_v60, %v71_v39  ;;  %v247_v6 = vadd.f32 %v246_v61, %v71_v39  ;;  %vm257_vm1 = vcmp.gt.f32.partialorder %v162_v56, 0.0  ;;  %v269_v7 = vmul.f32 0.05, %v162_v56 }
  0xd6   :  { %vm259_vm2 = vcmp.gt.f32.partialorder %v245_v57, 0.0  ;;  %v271_v8 = vmul.f32 0.05, %v245_v57  ;;  %v278_v17 = vsel %vm254_vm5, %v158_v52, %v266_v2  ;;  %v280_v18 = vsel %vm256_vm6, %v241_v53, %v268_v4  ;;  %v487_v2 = vld [vmem:[%s1598_s3 + $0x28] sm:$0xff]  ;;  %v1339_v4 = vpop.permute.xlu0 %510 }
  0xd7   :  { %v270_v9 = vmul.f32 0.05, %v164_v5  ;;  %v272_v10 = vmul.f32 0.05, %v247_v6  ;;  %vm258_vm3 = vcmp.gt.f32.partialorder %v164_v5, 0.0  ;;  %vm260_vm4 = vcmp.gt.f32.partialorder %v247_v6, 0.0 }
  0xd8   :  { %v281_v15 = vsel %vm257_vm1, %v162_v56, %v269_v7  ;;  %v283_v16 = vsel %vm259_vm2, %v245_v57, %v271_v8  ;;  %vm518_vm6 = vcmask 130048   ;;  %v1341_v7 = vpop.permute.xlu1 %515 }
  0xd9   :  { %v282_v13 = vsel %vm258_vm3, %v164_v5, %v270_v9  ;;  %v284_v14 = vsel %vm260_vm4, %v247_v6, %v272_v10 }
  0xda   :  { %330 = vmatprep.subr.mxu0 %v282_v13  ;;  %407 = vmatprep.subr.mxu1 %v284_v14  ;;  %v501_v12 = vpop.permute.xlu0 %500 }
  0xdb   :  { %331 = vmatpush1.msra.mxu0 %v281_v15  ;;  %408 = vmatpush1.msra.mxu1 %v283_v16 }
  0xdc   :  { %332 = vmatprep.subr.mxu0 %v278_v17  ;;  %409 = vmatprep.subr.mxu1 %v280_v18  ;;  %v506_v15 = vpop.permute.xlu1 %505 }
  0xdd   :  { %333 = vmatpush1.msra.mxu0 %v277_v19  ;;  %410 = vmatpush1.msra.mxu1 %v279_v20 }
  0xde   :  { %334 = vmatprep.subr.mxu0 %v274_v21  ;;  %411 = vmatprep.subr.mxu1 %v276_v22  ;;  %v491_v20 = vpop.permute.xlu0 %490 }
  0xdf   :  { %335 = vmatpush1.msra.mxu0 %v273_v24  ;;  %412 = vmatpush1.msra.mxu1 %v275_v25 }
  0xe0   :  { %1077 = vmatmul.mubr.msk.f32.vlgmr.msra.gmra.mxu0 %vm297_vm13, %v285_v23  ;;  %1079 = vmatmul.mubr.msk.f32.vlgmr.msra.gmra.mxu1 %vm297_vm13, %v285_v23  ;;  %v496_v25 = vpop.permute.xlu1 %495 }
  0xe1   :  { %374 = vmatprep.mubr.f32.mxu0 %v1107_v3  ;;  %451 = vmatprep.mubr.f32.mxu1 %v1107_v3 }
  0xe4   :  { %1078 = vmatmul.mubr.msk.f32.gmra.mxu0 %vm297_vm13, %v286_v26  ;;  %1080 = vmatmul.mubr.msk.f32.gmra.mxu1 %vm297_vm13, %v286_v26 }
  0xe5   :  { %601 = vmatprep.mubr.f32.mxu0 %v1107_v3  ;;  %702 = vmatprep.mubr.f32.mxu1 %v1107_v3 }
 0x1a0   :  { %v370_v27 = vpop.f32.mrf.mxu0  ;;  %v447_v28 = vpop.f32.mrf.mxu1 }
 0x1a1   :  { %v371_v41 = vadd.f32 %v370_v27, %v290_v31  ;;  %v448_v42 = vadd.f32 %v447_v28, %v290_v31 }
 0x1a2   :  { %v372_v29 = vpop.f32.mrf.mxu0  ;;  %v449_v30 = vpop.f32.mrf.mxu1 }
 0x1a3   :  { %v373_v33 = vadd.f32 %v372_v29, %v290_v31  ;;  %v450_v34 = vadd.f32 %v449_v30, %v290_v31  ;;  %v466_v51 = vmul.f32 0.05, %v371_v41  ;;  %v468_v52 = vmul.f32 0.05, %v448_v42 }
 0x1a4   :  { %v376_v35 = vpop.f32.mrf.mxu0  ;;  %v453_v36 = vpop.f32.mrf.mxu1  ;;  %vm458_vm4 = vcmp.gt.f32.partialorder %v371_v41, 0.0  ;;  %vm460_vm5 = vcmp.gt.f32.partialorder %v448_v42, 0.0 }
 0x1a5   :  { %v377_v37 = vadd.f32 %v376_v35, %v295_v32  ;;  %v454_v38 = vadd.f32 %v453_v36, %v295_v32  ;;  %v467_v43 = vmul.f32 0.05, %v373_v33  ;;  %v469_v44 = vmul.f32 0.05, %v450_v34 }
 0x1a6   :  { %v378_v39 = vpop.f32.mrf.mxu0  ;;  %v455_v40 = vpop.f32.mrf.mxu1  ;;  %vm459_vm2 = vcmp.gt.f32.partialorder %v373_v33, 0.0  ;;  %vm461_vm3 = vcmp.gt.f32.partialorder %v450_v34, 0.0  ;;  %v474_v60 = vsel %vm458_vm4, %v371_v41, %v466_v51  ;;  %v476_v61 = vsel %vm460_vm5, %v448_v42, %v468_v52 }
 0x1a7   :  { %v379_v45 = vadd.f32 %v378_v39, %v295_v32  ;;  %v456_v46 = vadd.f32 %v455_v40, %v295_v32  ;;  %vm462_vm14 = vcmp.gt.f32.partialorder %v377_v37, 0.0  ;;  %v470_v47 = vmul.f32 0.05, %v377_v37 }
 0x1a8   :  { %vm464_vm15 = vcmp.gt.f32.partialorder %v454_v38, 0.0  ;;  %v472_v48 = vmul.f32 0.05, %v454_v38  ;;  %v475_v57 = vsel %vm459_vm2, %v373_v33, %v467_v43  ;;  %v477_v58 = vsel %vm461_vm3, %v450_v34, %v469_v44 }
 0x1a9   :  { %v471_v49 = vmul.f32 0.05, %v379_v45  ;;  %v473_v50 = vmul.f32 0.05, %v456_v46  ;;  %vm463_vm0 = vcmp.gt.f32.partialorder %v379_v45, 0.0  ;;  %vm465_vm1 = vcmp.gt.f32.partialorder %v456_v46, 0.0 }
 0x1aa   :  { %v478_v55 = vsel %vm462_vm14, %v377_v37, %v470_v47  ;;  %v480_v56 = vsel %vm464_vm15, %v454_v38, %v472_v48 }
 0x1ab   :  { %v479_v53 = vsel %vm463_vm0, %v379_v45, %v471_v49  ;;  %v481_v54 = vsel %vm465_vm1, %v456_v46, %v473_v50 }
 0x1ac   :  { %565 = vmatprep.subr.mxu0 %v479_v53  ;;  %666 = vmatprep.subr.mxu1 %v481_v54 }
 0x1ad   :  { %566 = vmatpush1.msra.mxu0 %v478_v55  ;;  %667 = vmatpush1.msra.mxu1 %v480_v56 }
 0x1ae   :  { %567 = vmatprep.subr.mxu0 %v475_v57  ;;  %668 = vmatprep.subr.mxu1 %v477_v58 }
 0x1af   :  { %568 = vmatpush1.msra.mxu0 %v474_v60  ;;  %669 = vmatpush1.msra.mxu1 %v476_v61 }
 0x1b0   :  { %1081 = vmatmul.mubr.msk.f32.vlgmr.msra.gmra.mxu0 %vm518_vm6, %v482_v59  ;;  %1087 = vmatmul.mubr.msk.f32.vlgmr.msra.gmra.mxu1 %vm518_vm6, %v482_v59 }
 0x1b1   :  { %607 = vmatprep.mubr.f32.mxu0 %v1107_v3  ;;  %708 = vmatprep.mubr.f32.mxu1 %v1107_v3 }
 0x1b4   :  { %1082 = vmatmul.mubr.msk.f32.gmra.mxu0 %vm518_vm6, %v483_v62  ;;  %1088 = vmatmul.mubr.msk.f32.gmra.mxu1 %vm518_vm6, %v483_v62 }
 0x1b5   :  { %613 = vmatprep.mubr.f32.mxu0 %v1107_v3  ;;  %714 = vmatprep.mubr.f32.mxu1 %v1107_v3 }
 0x1b8   :  { %1083 = vmatmul.mubr.msk.f32.gmra.mxu0 %vm518_vm6, %v484_v63  ;;  %1089 = vmatmul.mubr.msk.f32.gmra.mxu1 %vm518_vm6, %v484_v63 }
 0x1b9   :  { %619 = vmatprep.mubr.f32.mxu0 %v1107_v3  ;;  %720 = vmatprep.mubr.f32.mxu1 %v1107_v3 }
 0x1bc   :  { %1084 = vmatmul.mubr.msk.f32.gmra.mxu0 %vm518_vm6, %v485_v0  ;;  %1090 = vmatmul.mubr.msk.f32.gmra.mxu1 %vm518_vm6, %v485_v0 }
 0x1bd   :  { %625 = vmatprep.mubr.f32.mxu0 %v1107_v3  ;;  %726 = vmatprep.mubr.f32.mxu1 %v1107_v3 }
 0x1c0   :  { %1085 = vmatmul.mubr.msk.f32.gmra.mxu0 %vm518_vm6, %v486_v1  ;;  %1091 = vmatmul.mubr.msk.f32.gmra.mxu1 %vm518_vm6, %v486_v1 }
 0x1c1   :  { %631 = vmatprep.mubr.f32.mxu0 %v1107_v3  ;;  %732 = vmatprep.mubr.f32.mxu1 %v1107_v3 }
 0x1c4   :  { %1086 = vmatmul.mubr.msk.f32.gmra.mxu0 %vm518_vm6, %v487_v2  ;;  %1092 = vmatmul.mubr.msk.f32.gmra.mxu1 %vm518_vm6, %v487_v2 }
 0x1c5   :  { %921 = vmatprep.mubr.f32.mxu0 %v1107_v3  ;;  %1016 = vmatprep.mubr.f32.mxu1 %v1107_v3 }
 0x270   :  { %v603_v5 = vpop.f32.mrf.mxu0  ;;  %v704_v6 = vpop.f32.mrf.mxu1 }
 0x271   :  { %v1343_v21 = vadd.f32 %v603_v5, %v491_v20  ;;  %v1345_v22 = vadd.f32 %v704_v6, %v491_v20 }
 0x272   :  { %v605_v8 = vpop.f32.mrf.mxu0  ;;  %v706_v9 = vpop.f32.mrf.mxu1 }
 0x273   :  { %v1347_v26 = vadd.f32 %v605_v8, %v491_v20  ;;  %v1349_v27 = vadd.f32 %v706_v9, %v491_v20  ;;  %v1358_v33 = vmul.f32 0.05, %v1343_v21  ;;  %v1361_v34 = vmul.f32 0.05, %v1345_v22 }
 0x274   :  { %v609_v10 = vpop.f32.mrf.mxu0  ;;  %v710_v11 = vpop.f32.mrf.mxu1 }
 0x275   :  { %v1351_v28 = vadd.f32 %v609_v10, %v496_v25  ;;  %v1353_v31 = vadd.f32 %v710_v11, %v496_v25  ;;  %v1368_v39 = vmul.f32 0.05, %v1347_v26  ;;  %v1371_v40 = vmul.f32 0.05, %v1349_v27 }
 0x276   :  { %v611_v13 = vpop.f32.mrf.mxu0  ;;  %v712_v14 = vpop.f32.mrf.mxu1 }
 0x277   :  { %v1355_v32 = vadd.f32 %v611_v13, %v496_v25  ;;  %v1363_v35 = vadd.f32 %v712_v14, %v496_v25  ;;  %v1378_v43 = vmul.f32 0.05, %v1351_v28  ;;  %v1387_v49 = vmul.f32 0.05, %v1353_v31 }
 0x278   :  { %v615_v16 = vpop.f32.mrf.mxu0  ;;  %v716_v17 = vpop.f32.mrf.mxu1 }
 0x279   :  { %v1365_v36 = vadd.f32 %v615_v16, %v501_v12  ;;  %v1373_v41 = vadd.f32 %v716_v17, %v501_v12  ;;  %v1390_v50 = vmul.f32 0.05, %v1355_v32  ;;  %v1397_v53 = vmul.f32 0.05, %v1363_v35 }
 0x27a   :  { %v617_v18 = vpop.f32.mrf.mxu0  ;;  %v718_v19 = vpop.f32.mrf.mxu1 }
 0x27b   :  { %v1375_v42 = vadd.f32 %v617_v18, %v501_v12  ;;  %v1380_v44 = vadd.f32 %v718_v19, %v501_v12  ;;  %v1400_v54 = vmul.f32 0.05, %v1365_v36  ;;  %v1405_v59 = vmul.f32 0.05, %v1373_v41 }
 0x27c   :  { %v621_v23 = vpop.f32.mrf.mxu0  ;;  %v722_v24 = vpop.f32.mrf.mxu1  ;;  %vm747_vm5 = vcmp.gt.f32.partialorder %v1365_v36, 0.0  ;;  %vm749_vm6 = vcmp.gt.f32.partialorder %v1373_v41, 0.0 }
 0x27d   :  { %v1382_v45 = vadd.f32 %v621_v23, %v506_v15  ;;  %v1384_v46 = vadd.f32 %v722_v24, %v506_v15  ;;  %v1408_v60 = vmul.f32 0.05, %v1375_v42  ;;  %v1413_v63 = vmul.f32 0.05, %v1380_v44 }
 0x27e   :  { %v623_v29 = vpop.f32.mrf.mxu0  ;;  %v724_v30 = vpop.f32.mrf.mxu1  ;;  %vm748_vm3 = vcmp.gt.f32.partialorder %v1375_v42, 0.0  ;;  %vm750_vm4 = vcmp.gt.f32.partialorder %v1380_v44, 0.0 }
 0x27f   :  { %v1392_v51 = vadd.f32 %v623_v29, %v506_v15  ;;  %v1394_v52 = vadd.f32 %v724_v30, %v506_v15  ;;  %v775_v0 = vmul.f32 0.05, %v1382_v45  ;;  %v777_v1 = vmul.f32 0.05, %v1384_v46 }
 0x280   :  { %v627_v37 = vpop.f32.mrf.mxu0  ;;  %v728_v38 = vpop.f32.mrf.mxu1  ;;  %vm751_vm1 = vcmp.gt.f32.partialorder %v1382_v45, 0.0  ;;  %vm753_vm2 = vcmp.gt.f32.partialorder %v1384_v46, 0.0 }
 0x281   :  { %v776_v6 = vmul.f32 0.05, %v1392_v51  ;;  %v778_v8 = vmul.f32 0.05, %v1394_v52  ;;  %v628_v9 = vadd.f32 %v627_v37, %v1339_v4  ;;  %v729_v10 = vadd.f32 %v728_v38, %v1339_v4 }
 0x282   :  { %v629_v47 = vpop.f32.mrf.mxu0  ;;  %v730_v48 = vpop.f32.mrf.mxu1  ;;  %vm752_vm15 = vcmp.gt.f32.partialorder %v1392_v51, 0.0  ;;  %vm754_vm0 = vcmp.gt.f32.partialorder %v1394_v52, 0.0 }
 0x283   :  { %v630_v55 = vadd.f32 %v629_v47, %v1339_v4  ;;  %v731_v56 = vadd.f32 %v730_v48, %v1339_v4  ;;  %v779_v19 = vmul.f32 0.05, %v628_v9  ;;  %v781_v20 = vmul.f32 0.05, %v729_v10 }
 0x284   :  { %v633_v57 = vpop.f32.mrf.mxu0  ;;  %v734_v58 = vpop.f32.mrf.mxu1  ;;  %vm755_vm13 = vcmp.gt.f32.partialorder %v628_v9, 0.0  ;;  %vm757_vm14 = vcmp.gt.f32.partialorder %v729_v10, 0.0  ;;  %v800_v38 = vsel %vm752_vm15, %v1392_v51, %v776_v6  ;;  %v802_v47 = vsel %vm754_vm0, %v1394_v52, %v778_v8 }
 0x285   :  { %v634_v61 = vadd.f32 %v633_v57, %v1341_v7  ;;  %v735_v62 = vadd.f32 %v734_v58, %v1341_v7  ;;  %v780_v11 = vmul.f32 0.05, %v630_v55  ;;  %v782_v12 = vmul.f32 0.05, %v731_v56 }
 0x286   :  { %v635_v2 = vpop.f32.mrf.mxu0  ;;  %v736_v5 = vpop.f32.mrf.mxu1  ;;  %vm756_vm11 = vcmp.gt.f32.partialorder %v630_v55, 0.0  ;;  %vm758_vm12 = vcmp.gt.f32.partialorder %v731_v56, 0.0  ;;  %v803_v30 = vsel %vm755_vm13, %v628_v9, %v779_v19  ;;  %v805_v37 = vsel %vm757_vm14, %v729_v10, %v781_v20 }
 0x287   :  { %v636_v13 = vadd.f32 %v635_v2, %v1341_v7  ;;  %v737_v14 = vadd.f32 %v736_v5, %v1341_v7  ;;  %vm759_vm7 = vcmp.gt.f32.partialorder %v634_v61, 0.0  ;;  %v783_v15 = vmul.f32 0.05, %v634_v61 }
 0x288   :  { %vm761_vm8 = vcmp.gt.f32.partialorder %v735_v62, 0.0  ;;  %v785_v16 = vmul.f32 0.05, %v735_v62  ;;  %v804_v25 = vsel %vm756_vm11, %v630_v55, %v780_v11  ;;  %v806_v29 = vsel %vm758_vm12, %v731_v56, %v782_v12 }
 0x289   :  { %v784_v17 = vmul.f32 0.05, %v636_v13  ;;  %v786_v18 = vmul.f32 0.05, %v737_v14  ;;  %vm760_vm9 = vcmp.gt.f32.partialorder %v636_v13, 0.0  ;;  %vm762_vm10 = vcmp.gt.f32.partialorder %v737_v14, 0.0 }
 0x28a   :  { %v807_v7 = vsel %vm759_vm7, %v634_v61, %v783_v15  ;;  %v809_v24 = vsel %vm761_vm8, %v735_v62, %v785_v16  ;;  %v799_v48 = vsel %vm751_vm1, %v1382_v45, %v775_v0  ;;  %v801_v55 = vsel %vm753_vm2, %v1384_v46, %v777_v1 }
 0x28b   :  { %v808_v4 = vsel %vm760_vm9, %v636_v13, %v784_v17  ;;  %v810_v23 = vsel %vm762_vm10, %v737_v14, %v786_v18  ;;  %vm744_vm7 = vcmp.gt.f32.partialorder %v1355_v32, 0.0  ;;  %vm746_vm8 = vcmp.gt.f32.partialorder %v1363_v35, 0.0 }
 0x28c   :  { %877 = vmatprep.subr.mxu0 %v808_v4  ;;  %972 = vmatprep.subr.mxu1 %v810_v23  ;;  %vm743_vm9 = vcmp.gt.f32.partialorder %v1351_v28, 0.0  ;;  %vm745_vm10 = vcmp.gt.f32.partialorder %v1353_v31, 0.0  ;;  %v796_v51 = vsel %vm748_vm3, %v1375_v42, %v1408_v60  ;;  %v798_v45 = vsel %vm750_vm4, %v1380_v44, %v1413_v63 }
 0x28d   :  { %878 = vmatpush1.msra.mxu0 %v807_v7  ;;  %973 = vmatpush1.msra.mxu1 %v809_v24  ;;  %v795_v46 = vsel %vm747_vm5, %v1365_v36, %v1400_v54  ;;  %v797_v52 = vsel %vm749_vm6, %v1373_v41, %v1405_v59  ;;  %vm740_vm11 = vcmp.gt.f32.partialorder %v1347_v26, 0.0  ;;  %vm742_vm12 = vcmp.gt.f32.partialorder %v1349_v27, 0.0  ;;  %v824_v54 = vpop.permute.xlu0 %823 }
 0x28e   :  { %879 = vmatprep.subr.mxu0 %v804_v25  ;;  %974 = vmatprep.subr.mxu1 %v806_v29  ;;  %vm739_vm13 = vcmp.gt.f32.partialorder %v1343_v21, 0.0  ;;  %vm741_vm14 = vcmp.gt.f32.partialorder %v1345_v22, 0.0  ;;  %v792_v36 = vsel %vm744_vm7, %v1355_v32, %v1390_v50  ;;  %v794_v41 = vsel %vm746_vm8, %v1363_v35, %v1397_v53  ;;  %v811_v50 = vld [vmem:[%s1599_s4] sm:$0xff] }
 0x28f   :  { %880 = vmatpush1.msra.mxu0 %v803_v30  ;;  %975 = vmatpush1.msra.mxu1 %v805_v37  ;;  %v791_v42 = vsel %vm743_vm9, %v1351_v28, %v1378_v43  ;;  %v793_v44 = vsel %vm745_vm10, %v1353_v31, %v1387_v49  ;;  %v788_v32 = vsel %vm740_vm11, %v1347_v26, %v1368_v39  ;;  %vm841_vm15 = vcmask 392192   ;;  %v815_v31 = vld [vmem:[%s1599_s4 + $0x20] sm:$0xff] }
 0x290   :  { %881 = vmatprep.subr.mxu0 %v800_v38  ;;  %976 = vmatprep.subr.mxu1 %v802_v47  ;;  %v790_v35 = vsel %vm742_vm12, %v1349_v27, %v1371_v40  ;;  %v787_v28 = vsel %vm739_vm13, %v1343_v21, %v1358_v33  ;;  %v789_v26 = vsel %vm741_vm14, %v1345_v22, %v1361_v34  ;;  %v812_v27 = vld [vmem:[%s1599_s4 + $0x8] sm:$0xff]  ;;  %v813_v21 = vld [vmem:[%s1599_s4 + $0x10] sm:$0xff]  ;;  %v814_v22 = vld [vmem:[%s1599_s4 + $0x18] sm:$0xff]  ;;  %v819_v33 = vpop.permute.xlu1 %818 }
 0x291   :  { %882 = vmatpush1.msra.mxu0 %v799_v48  ;;  %977 = vmatpush1.msra.mxu1 %v801_v55  ;;  %v834_v11 = vpop.permute.xlu0 %833 }
 0x292   :  { %883 = vmatprep.subr.mxu0 %v796_v51  ;;  %978 = vmatprep.subr.mxu1 %v798_v45 }
 0x293   :  { %884 = vmatpush1.msra.mxu0 %v795_v46  ;;  %979 = vmatpush1.msra.mxu1 %v797_v52 }
 0x294   :  { %885 = vmatprep.subr.mxu0 %v792_v36  ;;  %980 = vmatprep.subr.mxu1 %v794_v41  ;;  %v829_v63 = vpop.permute.xlu1 %828 }
 0x295   :  { %886 = vmatpush1.msra.mxu0 %v791_v42  ;;  %981 = vmatpush1.msra.mxu1 %v793_v44 }
 0x296   :  { %887 = vmatprep.subr.mxu0 %v788_v32  ;;  %982 = vmatprep.subr.mxu1 %v790_v35 }
 0x297   :  { %888 = vmatpush1.msra.mxu0 %v787_v28  ;;  %983 = vmatpush1.msra.mxu1 %v789_v26 }
 0x298   :  { %1093 = vmatmul.mubr.msk.f32.vlgmr.msra.gmra.mxu0 %vm841_vm15, %v811_v50  ;;  %1098 = vmatmul.mubr.msk.f32.vlgmr.msra.gmra.mxu1 %vm841_vm15, %v811_v50  ;;  %v839_v20 = vpop.permute.xlu1 %838 }
 0x299   :  { %927 = vmatprep.mubr.f32.mxu0 %v1107_v3  ;;  %1022 = vmatprep.mubr.f32.mxu1 %v1107_v3 }
 0x29c   :  { %1094 = vmatmul.mubr.msk.f32.gmra.mxu0 %vm841_vm15, %v812_v27  ;;  %1099 = vmatmul.mubr.msk.f32.gmra.mxu1 %vm841_vm15, %v812_v27 }
 0x29d   :  { %933 = vmatprep.mubr.f32.mxu0 %v1107_v3  ;;  %1028 = vmatprep.mubr.f32.mxu1 %v1107_v3 }
 0x2a0   :  { %1095 = vmatmul.mubr.msk.f32.gmra.mxu0 %vm841_vm15, %v813_v21  ;;  %1100 = vmatmul.mubr.msk.f32.gmra.mxu1 %vm841_vm15, %v813_v21 }
 0x2a1   :  { %939 = vmatprep.mubr.f32.mxu0 %v1107_v3  ;;  %1034 = vmatprep.mubr.f32.mxu1 %v1107_v3 }
 0x2a4   :  { %1096 = vmatmul.mubr.msk.f32.gmra.mxu0 %vm841_vm15, %v814_v22  ;;  %1101 = vmatmul.mubr.msk.f32.gmra.mxu1 %vm841_vm15, %v814_v22 }
 0x2a5   :  { %945 = vmatprep.mubr.f32.mxu0 %v1107_v3  ;;  %1040 = vmatprep.mubr.f32.mxu1 %v1107_v3 }
 0x2a8   :  { %1097 = vmatmul.mubr.msk.f32.gmra.mxu0 %vm841_vm15, %v815_v31  ;;  %1102 = vmatmul.mubr.msk.f32.gmra.mxu1 %vm841_vm15, %v815_v31 }
 0x358   :  { %v923_v34 = vpop.f32.mrf.mxu0  ;;  %v1018_v39 = vpop.f32.mrf.mxu1 }
 0x359   :  { %v924_v40 = vadd.f32 %v923_v34, %v819_v33  ;;  %v1019_v43 = vadd.f32 %v1018_v39, %v819_v33 }
 0x35a   :  { %v925_v49 = vpop.f32.mrf.mxu0  ;;  %v1020_v53 = vpop.f32.mrf.mxu1 }
 0x35b   :  { %1047 = vst [vmem:[%s1600_s6] sm:$0xff] %v924_v40  ;;  %1049 = vst [vmem:[%s1600_s6 + $0x10] sm:$0xff] %v1019_v43  ;;  %v926_v3 = vadd.f32 %v925_v49, %v819_v33  ;;  %v1021_v56 = vadd.f32 %v1020_v53, %v819_v33 }
 0x35c   :  { %v929_v57 = vpop.f32.mrf.mxu0  ;;  %v1024_v58 = vpop.f32.mrf.mxu1 }
 0x35d   :  { %1048 = vst [vmem:[%s1600_s6 + $0x8] sm:$0xff] %v926_v3  ;;  %1050 = vst [vmem:[%s1600_s6 + $0x18] sm:$0xff] %v1021_v56  ;;  %v930_v59 = vadd.f32 %v929_v57, %v824_v54  ;;  %v1025_v60 = vadd.f32 %v1024_v58, %v824_v54 }
 0x35e   :  { %v931_v61 = vpop.f32.mrf.mxu0  ;;  %v1026_v62 = vpop.f32.mrf.mxu1 }
 0x35f   :  { %1051 = vst [vmem:[%s1600_s6 + $0x20] sm:$0xff] %v930_v59  ;;  %1053 = vst [vmem:[%s1600_s6 + $0x30] sm:$0xff] %v1025_v60  ;;  %v932_v0 = vadd.f32 %v931_v61, %v824_v54  ;;  %v1027_v1 = vadd.f32 %v1026_v62, %v824_v54 }
 0x360   :  { %v935_v2 = vpop.f32.mrf.mxu0  ;;  %v1030_v5 = vpop.f32.mrf.mxu1 }
 0x361   :  { %1052 = vst [vmem:[%s1600_s6 + $0x28] sm:$0xff] %v932_v0  ;;  %1054 = vst [vmem:[%s1600_s6 + $0x38] sm:$0xff] %v1027_v1  ;;  %v936_v6 = vadd.f32 %v935_v2, %v829_v63  ;;  %v1031_v8 = vadd.f32 %v1030_v5, %v829_v63 }
 0x362   :  { %v937_v9 = vpop.f32.mrf.mxu0  ;;  %v1032_v10 = vpop.f32.mrf.mxu1 }
 0x363   :  { %1055 = vst [vmem:[%s1600_s6 + $0x40] sm:$0xff] %v936_v6  ;;  %1057 = vst [vmem:[%s1600_s6 + $0x50] sm:$0xff] %v1031_v8  ;;  %v938_v12 = vadd.f32 %v937_v9, %v829_v63  ;;  %v1033_v13 = vadd.f32 %v1032_v10, %v829_v63 }
 0x364   :  { %v941_v14 = vpop.f32.mrf.mxu0  ;;  %v1036_v15 = vpop.f32.mrf.mxu1 }
 0x365   :  { %1056 = vst [vmem:[%s1600_s6 + $0x48] sm:$0xff] %v938_v12  ;;  %1058 = vst [vmem:[%s1600_s6 + $0x58] sm:$0xff] %v1033_v13  ;;  %v942_v16 = vadd.f32 %v941_v14, %v834_v11  ;;  %v1037_v17 = vadd.f32 %v1036_v15, %v834_v11 }
 0x366   :  { %v943_v18 = vpop.f32.mrf.mxu0  ;;  %v1038_v19 = vpop.f32.mrf.mxu1 }
 0x367   :  { %1059 = vst [vmem:[%s1600_s6 + $0x60] sm:$0xff] %v942_v16  ;;  %1061 = vst [vmem:[%s1600_s6 + $0x70] sm:$0xff] %v1037_v17  ;;  %v944_v4 = vadd.f32 %v943_v18, %v834_v11  ;;  %v1039_v23 = vadd.f32 %v1038_v19, %v834_v11 }
 0x368   :  { %v947_v7 = vpop.f32.mrf.mxu0  ;;  %v1042_v24 = vpop.f32.mrf.mxu1 }
 0x369   :  { %1060 = vst [vmem:[%s1600_s6 + $0x68] sm:$0xff] %v944_v4  ;;  %1062 = vst [vmem:[%s1600_s6 + $0x78] sm:$0xff] %v1039_v23  ;;  %v948_v25 = vadd.f32 %v947_v7, %v839_v20  ;;  %v1043_v29 = vadd.f32 %v1042_v24, %v839_v20 }
 0x36a   :  { %v949_v30 = vpop.f32.mrf.mxu0  ;;  %v1044_v37 = vpop.f32.mrf.mxu1 }
 0x36b   :  { %1063 = vst [vmem:[%s1600_s6 + $0x80] sm:$0xff] %v948_v25  ;;  %1065 = vst [vmem:[%s1600_s6 + $0x90] sm:$0xff] %v1043_v29  ;;  %v950_v38 = vadd.f32 %v949_v30, %v839_v20  ;;  %v1045_v47 = vadd.f32 %v1044_v37, %v839_v20 }
 0x36d   :  { %1064 = vst [vmem:[%s1600_s6 + $0x88] sm:$0xff] %v950_v38  ;;  %1066 = vst [vmem:[%s1600_s6 + $0x98] sm:$0xff] %v1045_v47 }

</bundles_post_ra>
